<compile_context>
chip_gen: v7x
topology: tpu7x:2x2x1
jax: 0.10.0
libtpu: 0.0.40
codegen_flags: <defaults>
</compile_context>

<pallas_src>
import jax
import jax.numpy as jnp
import numpy as np
from jax.experimental import pallas as pl
from jax.experimental.pallas import tpu as pltpu

_LANES = 128
_STATS = 8          # rows: n, sx, sy, sxx, syy, sxy, 0, 0 -> exact (8,128) tile


def _round_up(a, b):
    return (a + b - 1) // b * b


def _cdiv(a, b):
    return -(-a // b)


def _make_stats_kernel(tile_rows, n_elem, has_mask, exact):
    """Build the per-tile partial-moment kernel.

    exact=True means: no user mask, n_elem fills the (rows,128) layout exactly
    and rows % tile_rows == 0, so no validity mask is needed at all (n is
    counted analytically in the wrapper).
    """

    def kernel(shift_ref, pred_ref, gt_ref, *rest):
        if has_mask:
            mask_ref, out_ref = rest
        else:
            (out_ref,) = rest

        # Native-dtype stream, upcast + shift in-kernel (VPU, hidden under DMA).
        # Pearson is shift-invariant; the shift de-conditions the one-pass
        # moment algebra (|x - shift| ~ |x - mean| for depth maps).
        x = pred_ref[...].astype(jnp.float32) - shift_ref[0]
        y = gt_ref[...].astype(jnp.float32) - shift_ref[1]

        if exact:
            xm, ym = x, y
            n_row = jnp.full((1, _LANES), np.float32(tile_rows), jnp.float32)
        else:
            # Validity of each element of this (tile_rows, 128) block:
            #  * global flat index < n_elem (covers the zero-padded lane tail
            #    of the last row AND the unspecified contents of the
            #    out-of-bounds rows of a partial edge block), and
            #  * the user mask, streamed as int8 and tested in-kernel.
            row0 = pl.program_id(0) * tile_rows
            row_id = jax.lax.broadcasted_iota(jnp.int32, (tile_rows, _LANES), 0)
            lane_id = jax.lax.broadcasted_iota(jnp.int32, (tile_rows, _LANES), 1)
            flat = (row0 + row_id) * _LANES + lane_id
            valid = flat < n_elem
            if has_mask:
                valid = jnp.logical_and(valid, mask_ref[...] != 0)
            # jnp.where (not multiply-by-zero) so NaN/Inf garbage in padded
            # regions can never propagate into the sums.
            xm = jnp.where(valid, x, 0.0)
            ym = jnp.where(valid, y, 0.0)
            n_row = jnp.sum(valid.astype(jnp.float32), axis=0, keepdims=True)

        # Reduce over sublanes only; lanes stay dense and are summed in the
        # wrapper (tiny (num_tiles, 8, 128) reduction).
        sx_row = jnp.sum(xm, axis=0, keepdims=True)
        sy_row = jnp.sum(ym, axis=0, keepdims=True)
        sxx_row = jnp.sum(xm * xm, axis=0, keepdims=True)
        syy_row = jnp.sum(ym * ym, axis=0, keepdims=True)
        sxy_row = jnp.sum(xm * ym, axis=0, keepdims=True)

        # Direct aligned row stores (no sublane concatenate / XLU relayout).
        out_ref[0:1, :] = n_row
        out_ref[1:2, :] = sx_row
        out_ref[2:3, :] = sy_row
        out_ref[3:4, :] = sxx_row
        out_ref[4:5, :] = syy_row
        out_ref[5:6, :] = sxy_row
        out_ref[6:8, :] = jnp.zeros((2, _LANES), jnp.float32)

    return kernel


def _pearson_partial_stats(shift, x2d, y2d, mask2d, n_elem, tile_rows,
                           num_tiles, exact):
    has_mask = mask2d is not None
    kernel = _make_stats_kernel(tile_rows, n_elem, has_mask, exact)

    # Scalar shift values live in SMEM (no VMEM stream for them).
    in_specs = [pl.BlockSpec(memory_space=pltpu.MemorySpace.SMEM)]
    operands = [shift]
    streams = (x2d, y2d) + ((mask2d,) if has_mask else ())
    for arr in streams:
        in_specs.append(pl.BlockSpec((tile_rows, _LANES), lambda i: (i, 0)))
        operands.append(arr)

    # Explicit VMEM budget: double-buffered input tiles + tiny output tiles.
    bpe = x2d.dtype.itemsize + y2d.dtype.itemsize + (1 if has_mask else 0)
    tile_in_bytes = tile_rows * _LANES * bpe
    vmem_bytes = int(min(max(6 * tile_in_bytes, 8 << 20), 48 << 20))

    return pl.pallas_call(
        kernel,
        out_shape=jax.ShapeDtypeStruct((num_tiles, _STATS, _LANES), jnp.float32),
        grid_spec=pltpu.PrefetchScalarGridSpec(
            num_scalar_prefetch=0,
            grid=(num_tiles,),
            in_specs=in_specs,
            # Squeezed leading dim: kernel sees an (8,128) lane-dense tile.
            out_specs=pl.BlockSpec((None, _STATS, _LANES),
                                   lambda i: (i, 0, 0)),
        ),
        compiler_params=pltpu.CompilerParams(
            dimension_semantics=("parallel",),   # each step owns its out block
            vmem_limit_bytes=vmem_bytes),
    )(*operands)


def _to_rows(flat, n_elem, rows):
    pad = rows * _LANES - n_elem
    if pad:                                   # only the <128-element lane tail
        flat = jnp.pad(flat, (0, pad))
    return flat.reshape(rows, _LANES)


def pearson_depth_loss(pred_depth, gt_depth, eps=1e-6, err_mask=None,
                       *, tile_rows=1024):
    """1 - Pearson correlation between pred and gt depth (optionally masked)."""
    x = jnp.asarray(pred_depth).reshape(-1)        # native dtype (bf16/f32/...)
    y = jnp.asarray(gt_depth).reshape(-1)
    n_elem = int(x.shape[0])
    has_mask = err_mask is not None

    rows = max(1, _cdiv(n_elem, _LANES))

    # Tile policy: multiples of 32 sublanes (covers f32/bf16/int8 tiling),
    # large by default (amortize ~0.35us/grid-step), but split into >=2
    # balanced tiles when there is enough work so v7x's two TensorCores both
    # run on the "parallel" grid axis.
    tile_rows = _round_up(max(32, min(int(tile_rows), rows)), 32)
    num_tiles = _cdiv(rows, tile_rows)
    if num_tiles == 1 and rows >= 64:
        num_tiles = 2
    if num_tiles > 1:
        tile_rows = _round_up(_cdiv(rows, num_tiles), 32)
        num_tiles = _cdiv(rows, tile_rows)

    # Lane-dense (rows, 128) views; metadata-only when n_elem % 128 == 0.
    x2d = _to_rows(x, n_elem, rows)
    y2d = _to_rows(y, n_elem, rows)
    mask2d = None
    if has_mask:
        m = jnp.asarray(err_mask).reshape(-1).astype(jnp.int8)   # 1 B/elem
        mask2d = _to_rows(m, n_elem, rows)

    exact = (not has_mask) and (n_elem == rows * _LANES) \
        and (rows % tile_rows == 0)

    # Cheap shift (first element of each map) so one-pass f32 moments do not
    # catastrophically cancel; mathematically exact for Pearson correlation.
    shift = jnp.stack([x[0], y[0]]).astype(jnp.float32)

    partials = _pearson_partial_stats(shift, x2d, y2d, mask2d, n_elem,
                                      tile_rows, num_tiles, exact)
    stats = jnp.sum(partials, axis=(0, 2))                      # (8,)

    n = stats[0] if has_mask else np.float32(n_elem)   # analytic n when unmasked
    sx, sy, sxx, syy, sxy = stats[1], stats[2], stats[3], stats[4], stats[5]

    # Degenerate masks (n < 2) would be NaN in the torch reference as well;
    # clamp the denominators so a finite value is returned.
    n_safe = jnp.maximum(n, 1.0)
    nm1_safe = jnp.maximum(n - 1.0, 1.0)
    mean_x = sx / n_safe
    mean_y = sy / n_safe
    var_x = jnp.maximum((sxx - n * mean_x * mean_x) / nm1_safe, 0.0)
    var_y = jnp.maximum((syy - n * mean_y * mean_y) / nm1_safe, 0.0)
    std_x = jnp.sqrt(var_x)                      # torch.std(): unbiased (n-1)
    std_y = jnp.sqrt(var_y)
    cov_sum = sxy - n * mean_x * mean_y          # sum((x-mx)*(y-my))
    co = cov_sum / (n_safe * (std_x + eps) * (std_y + eps))
    return 1.0 - co


class GlobalPearsonDepthLoss:
    eps = 1e-6

    def __init__(self, mode=None):
        self.mode = mode

    def __call__(self, pred_depth, gt_depth, motion_mask=None, **kwargs):
        err_mask = None
        if motion_mask is not None:
            if self.mode == 'static':
                err_mask = jnp.logical_not(motion_mask)
            elif self.mode == 'dynamic':
                err_mask = motion_mask
        return pearson_depth_loss(pred_depth, gt_depth, self.eps, err_mask)


def _reference_pearson_loss(pred, gt, eps, mask=None):
    """NumPy (f64) reference matching the assumed torch pearson_depth_loss."""
    x = np.asarray(pred, np.float64).reshape(-1)
    y = np.asarray(gt, np.float64).reshape(-1)
    if mask is not None:
        m = np.asarray(mask).reshape(-1).astype(bool)
        x = x[m]
        y = y[m]
    xn = (x - x.mean()) / (x.std(ddof=1) + eps)
    yn = (y - y.mean()) / (y.std(ddof=1) + eps)
    return 1.0 - (xn * yn).mean()


if __name__ == "__main__":
    key = jax.random.PRNGKey(0)

    # (64,64): n_elem divides 128 exactly (exact fast path, 32 rows, 1 tile).
    # (48,100): ragged -> lane-tail pad + partial edge block masked in-kernel.
    for (H, W) in [(64, 64), (48, 100)]:
        key, k1, k2, k3 = jax.random.split(key, 4)
        pred = jax.random.uniform(k1, (H, W), jnp.float32, 0.5, 5.0)
        gt = (1.7 * pred + 0.3
              + 0.75 * jax.random.normal(k2, (H, W), jnp.float32))
        mm = jax.random.bernoulli(k3, 0.35, (H, W))

        got = {
            "none": GlobalPearsonDepthLoss(mode=None)(pred, gt, mm),
            "static": GlobalPearsonDepthLoss(mode='static')(pred, gt, mm),
            "dynamic": GlobalPearsonDepthLoss(mode='dynamic')(pred, gt, mm),
        }
        got = {k: float(jax.block_until_ready(v)) for k, v in got.items()}

        mm_np = np.asarray(mm)
        want = {
            "none": _reference_pearson_loss(pred, gt, 1e-6, None),
            "static": _reference_pearson_loss(pred, gt, 1e-6, ~mm_np),
            "dynamic": _reference_pearson_loss(pred, gt, 1e-6, mm_np),
        }
        for name in got:
            assert np.allclose(got[name], float(want[name]),
                               rtol=1e-3, atol=1e-4), \
                (H, W, name, got[name], float(want[name]))

    # bf16 inputs streamed natively (half the input bytes), upcast in-kernel.
    key, k1, k2 = jax.random.split(key, 3)
    pred16 = jax.random.uniform(k1, (64, 64), jnp.float32, 0.5, 5.0
                                ).astype(jnp.bfloat16)
    gt16 = (1.7 * pred16.astype(jnp.float32) + 0.3
            + 0.75 * jax.random.normal(k2, (64, 64), jnp.float32)
            ).astype(jnp.bfloat16)
    got16 = float(jax.block_until_ready(
        GlobalPearsonDepthLoss(mode=None)(pred16, gt16)))
    want16 = _reference_pearson_loss(np.asarray(pred16.astype(jnp.float32)),
                                     np.asarray(gt16.astype(jnp.float32)),
                                     1e-6, None)
    assert np.allclose(got16, float(want16), rtol=1e-3, atol=1e-3), \
        (got16, float(want16))

    print("KERNEL_OK")
</pallas_src>

<mosaic_0001>
module attributes {stable_mosaic.version = 11 : i64} {
  func.func @kernel(%arg0: i32, %arg1: memref<2xf32, #tpu.memory_space<smem>>, %arg2: memref<32x128xf32, #tpu.memory_space<vmem>>, %arg3: memref<32x128xf32, #tpu.memory_space<vmem>>, %arg4: memref<1x8x128xf32, #tpu.memory_space<vmem>>) attributes {dimension_semantics = [#tpu.dimension_semantics<parallel>], iteration_bounds = array<i64: 1>, scalar_prefetch = 0 : i64, scratch_operands = 0 : i64, tpu.core_type = #tpu.core_type<tc>, window_params = [{transform_indices = @transform_0, window_bounds = array<i64: 2>}, {transform_indices = @transform_1, window_bounds = array<i64: 32, 128>}, {transform_indices = @transform_2, window_bounds = array<i64: 32, 128>}, {transform_indices = @transform_3, window_bounds = array<i64: 1, 8, 128>}]} {
    %c0 = arith.constant 0 : index
    %c0_0 = arith.constant 0 : index
    %0 = vector.load %arg2[%c0, %c0_0] : memref<32x128xf32, #tpu.memory_space<vmem>>, vector<32x128xf32>
    %c0_1 = arith.constant 0 : index
    %1 = memref.load %arg1[%c0_1] : memref<2xf32, #tpu.memory_space<smem>>
    %2 = vector.broadcast %1 : f32 to vector<32x128xf32>
    %3 = arith.subf %0, %2 : vector<32x128xf32>
    %c0_2 = arith.constant 0 : index
    %c0_3 = arith.constant 0 : index
    %4 = vector.load %arg3[%c0_2, %c0_3] : memref<32x128xf32, #tpu.memory_space<vmem>>, vector<32x128xf32>
    %c1 = arith.constant 1 : index
    %5 = memref.load %arg1[%c1] : memref<2xf32, #tpu.memory_space<smem>>
    %6 = vector.broadcast %5 : f32 to vector<32x128xf32>
    %7 = arith.subf %4, %6 : vector<32x128xf32>
    %cst = arith.constant 3.200000e+01 : f32
    %8 = vector.broadcast %cst : f32 to vector<1x128xf32>
    %cst_4 = arith.constant dense<0.000000e+00> : vector<128xf32>
    %9 = vector.multi_reduction <add>, %3, %cst_4 [0] : vector<32x128xf32> to vector<128xf32>
    %10 = vector.shape_cast %9 : vector<128xf32> to vector<1x128xf32>
    %cst_5 = arith.constant dense<0.000000e+00> : vector<128xf32>
    %11 = vector.multi_reduction <add>, %7, %cst_5 [0] : vector<32x128xf32> to vector<128xf32>
    %12 = vector.shape_cast %11 : vector<128xf32> to vector<1x128xf32>
    %13 = arith.mulf %3, %3 : vector<32x128xf32>
    %cst_6 = arith.constant dense<0.000000e+00> : vector<128xf32>
    %14 = vector.multi_reduction <add>, %13, %cst_6 [0] : vector<32x128xf32> to vector<128xf32>
    %15 = vector.shape_cast %14 : vector<128xf32> to vector<1x128xf32>
    %16 = arith.mulf %7, %7 : vector<32x128xf32>
    %cst_7 = arith.constant dense<0.000000e+00> : vector<128xf32>
    %17 = vector.multi_reduction <add>, %16, %cst_7 [0] : vector<32x128xf32> to vector<128xf32>
    %18 = vector.shape_cast %17 : vector<128xf32> to vector<1x128xf32>
    %19 = arith.mulf %3, %7 : vector<32x128xf32>
    %cst_8 = arith.constant dense<0.000000e+00> : vector<128xf32>
    %20 = vector.multi_reduction <add>, %19, %cst_8 [0] : vector<32x128xf32> to vector<128xf32>
    %21 = vector.shape_cast %20 : vector<128xf32> to vector<1x128xf32>
    %c0_9 = arith.constant 0 : index
    %c0_10 = arith.constant 0 : index
    %c0_11 = arith.constant 0 : index
    %22 = vector.load %arg4[%c0_9, %c0_10, %c0_11] : memref<1x8x128xf32, #tpu.memory_space<vmem>>, vector<1x1x128xf32>
    %23 = vector.shape_cast %22 : vector<1x1x128xf32> to vector<1x128xf32>
    %24 = vector.shape_cast %8 : vector<1x128xf32> to vector<1x1x128xf32>
    tpu.vector_store %arg4[%c0_9, %c0_10, %c0_11], %24 {strides = array<i32>} : memref<1x8x128xf32, #tpu.memory_space<vmem>>, vector<1x1x128xf32>,
    %c0_12 = arith.constant 0 : index
    %c1_13 = arith.constant 1 : index
    %c0_14 = arith.constant 0 : index
    %25 = vector.load %arg4[%c0_12, %c1_13, %c0_14] : memref<1x8x128xf32, #tpu.memory_space<vmem>>, vector<1x1x128xf32>
    %26 = vector.shape_cast %25 : vector<1x1x128xf32> to vector<1x128xf32>
    %27 = vector.shape_cast %10 : vector<1x128xf32> to vector<1x1x128xf32>
    tpu.vector_store %arg4[%c0_12, %c1_13, %c0_14], %27 {strides = array<i32>} : memref<1x8x128xf32, #tpu.memory_space<vmem>>, vector<1x1x128xf32>,
    %c0_15 = arith.constant 0 : index
    %c2 = arith.constant 2 : index
    %c0_16 = arith.constant 0 : index
    %28 = vector.load %arg4[%c0_15, %c2, %c0_16] : memref<1x8x128xf32, #tpu.memory_space<vmem>>, vector<1x1x128xf32>
    %29 = vector.shape_cast %28 : vector<1x1x128xf32> to vector<1x128xf32>
    %30 = vector.shape_cast %12 : vector<1x128xf32> to vector<1x1x128xf32>
    tpu.vector_store %arg4[%c0_15, %c2, %c0_16], %30 {strides = array<i32>} : memref<1x8x128xf32, #tpu.memory_space<vmem>>, vector<1x1x128xf32>,
    %c0_17 = arith.constant 0 : index
    %c3 = arith.constant 3 : index
    %c0_18 = arith.constant 0 : index
    %31 = vector.load %arg4[%c0_17, %c3, %c0_18] : memref<1x8x128xf32, #tpu.memory_space<vmem>>, vector<1x1x128xf32>
    %32 = vector.shape_cast %31 : vector<1x1x128xf32> to vector<1x128xf32>
    %33 = vector.shape_cast %15 : vector<1x128xf32> to vector<1x1x128xf32>
    tpu.vector_store %arg4[%c0_17, %c3, %c0_18], %33 {strides = array<i32>} : memref<1x8x128xf32, #tpu.memory_space<vmem>>, vector<1x1x128xf32>,
    %c0_19 = arith.constant 0 : index
    %c4 = arith.constant 4 : index
    %c0_20 = arith.constant 0 : index
    %34 = vector.load %arg4[%c0_19, %c4, %c0_20] : memref<1x8x128xf32, #tpu.memory_space<vmem>>, vector<1x1x128xf32>
    %35 = vector.shape_cast %34 : vector<1x1x128xf32> to vector<1x128xf32>
    %36 = vector.shape_cast %18 : vector<1x128xf32> to vector<1x1x128xf32>
    tpu.vector_store %arg4[%c0_19, %c4, %c0_20], %36 {strides = array<i32>} : memref<1x8x128xf32, #tpu.memory_space<vmem>>, vector<1x1x128xf32>,
    %c0_21 = arith.constant 0 : index
    %c5 = arith.constant 5 : index
    %c0_22 = arith.constant 0 : index
    %37 = vector.load %arg4[%c0_21, %c5, %c0_22] : memref<1x8x128xf32, #tpu.memory_space<vmem>>, vector<1x1x128xf32>
    %38 = vector.shape_cast %37 : vector<1x1x128xf32> to vector<1x128xf32>
    %39 = vector.shape_cast %21 : vector<1x128xf32> to vector<1x1x128xf32>
    tpu.vector_store %arg4[%c0_21, %c5, %c0_22], %39 {strides = array<i32>} : memref<1x8x128xf32, #tpu.memory_space<vmem>>, vector<1x1x128xf32>,
    %cst_23 = arith.constant 0.000000e+00 : f32
    %40 = vector.broadcast %cst_23 : f32 to vector<2x128xf32>
    %c0_24 = arith.constant 0 : index
    %c6 = arith.constant 6 : index
    %c0_25 = arith.constant 0 : index
    %41 = vector.load %arg4[%c0_24, %c6, %c0_25] : memref<1x8x128xf32, #tpu.memory_space<vmem>>, vector<1x2x128xf32>
    %42 = vector.shape_cast %41 : vector<1x2x128xf32> to vector<2x128xf32>
    %43 = vector.shape_cast %40 : vector<2x128xf32> to vector<1x2x128xf32>
    tpu.vector_store %arg4[%c0_24, %c6, %c0_25], %43 {strides = array<i32>} : memref<1x8x128xf32, #tpu.memory_space<vmem>>, vector<1x2x128xf32>,
    return
  }
  func.func @transform_0(%arg0: i32) -> i32 {
    %c0_i32 = arith.constant 0 : i32
    %c0_i32_0 = arith.constant 0 : i32
    return %c0_i32 : i32
  }
  func.func @transform_1(%arg0: i32) -> (i32, i32) {
    %c0_i32 = arith.constant 0 : i32
    %c0_i32_0 = arith.constant 0 : i32
    return %arg0, %c0_i32 : i32, i32
  }
  func.func @transform_2(%arg0: i32) -> (i32, i32) {
    %c0_i32 = arith.constant 0 : i32
    %c0_i32_0 = arith.constant 0 : i32
    return %arg0, %c0_i32 : i32, i32
  }
  func.func @transform_3(%arg0: i32) -> (i32, i32, i32) {
    %c0_i32 = arith.constant 0 : i32
    %c0_i32_0 = arith.constant 0 : i32
    %c0_i32_1 = arith.constant 0 : i32
    return %arg0, %c0_i32, %c0_i32_0 : i32, i32, i32
  }
}

</mosaic_0001>

<bundles_post_ra>
// kernel: tpu_custom_call.1
= control target key start
LH: loop header
LB: loop body
LE: loop exit
PB: predicated region body
PF: predicated region fallthrough
CT: control target
= control target key end

     0   :  { %8 = vsyncpa [#allocation5], 0  ;;  %s324_s0 = inlined_call_operand.hbm [shape: f32[2], index: 0, kind: input, shape index: {}]   ;;  %s325_s1 = inlined_call_operand.hbm [shape: f32[32,128], index: 1, kind: input, shape index: {}]   ;;  %s326_s2 = inlined_call_operand.hbm [shape: f32[32,128], index: 2, kind: input, shape index: {}]   ;;  %s327_s3 = inlined_call_operand.hbm [shape: f32[1,8,128], index: 3, kind: output, shape index: {}]  }
   0x1   :  { %9 = vsyncpa [#allocation3], 0 }
   0x2   :  { %10 = vsyncpa [#allocation8], 0 }
   0x3   :  { %11 = vsyncpa [#allocation4], 0  ;;  %s164_s14 = scalar_lea.hbm %s324_s0, 16 }
   0x4   :  { %p165_p0 = scmp.ne.s32.totalorder %s324_s0, %s164_s14  ;;  %p168_p1 = scmp.lt.u32.totalorder %s164_s14, %s324_s0 }
   0x6   :  { %p170_p2 = pnand %p168_p1, %p165_p0 }
   0x8   :  { %173 = shalt.err (!%p170_p2)
}
   0x9   :  { %s248_s19 = smov [#allocation2]   ;;  %s249_s22 = smov [#allocation6]  }
   0xa   :  { %19 = dma.hbm_to_smem %s324_s0, 16, %s248_s19, [#allocation5]  }
   0xb   :  { %s25_s23 = sshll.u32 %s249_s22, 4  ;;  %s174_s26 = scalar_lea.hbm %s325_s1, 512  ;;  %s26_s23 = int_to_ptr.vmem [resolvable:$true] %s25_s23 }
   0xc   :  { %p175_p3 = scmp.ne.s32.totalorder %s325_s1, %s174_s26  ;;  %p178_p4 = scmp.lt.u32.totalorder %s174_s26, %s325_s1 }
   0xe   :  { %p180_p5 = pnand %p178_p4, %p175_p3 }
  0x10   :  { %183 = shalt.err (!%p180_p5)
}
  0x11   :  { %s184_s4 = scalar_lea.vmem %s26_s23, 512  ;;  %p189_p7 = scmp.lt.s32.totalorder %s26_s23, %s26_s23 }
  0x12   :  { %p185_p6 = scmp.ne.s32.totalorder %s26_s23, %s184_s4  ;;  %p190_p8 = scmp.lt.s32.totalorder %s184_s4, %s184_s4 }
  0x14   :  { %p191_p9 = por %p190_p8, %p189_p7 }
  0x16   :  { %p192_p10 = pnand %p191_p9, %p185_p6 }
  0x18   :  { %195 = shalt.err (!%p192_p10)
}
  0x19   :  { %s250_s0 = smov 128   ;;  %s251_s5 = smov 8  }
  0x1a   :  { %31 = dma.hbm_to_vmem [thread:$0]  %s325_s1, 512, %s26_s23, [#allocation3], %s250_s0, %s250_s0, %s251_s5  }
  0x1b   :  { %s252_s8 = smov [#allocation7]   ;;  %s196_s12 = scalar_lea.hbm %s326_s2, 512 }
  0x1c   :  { %s37_s9 = sshll.u32 %s252_s8, 4  ;;  %p197_p11 = scmp.ne.s32.totalorder %s326_s2, %s196_s12  ;;  %s38_s9 = int_to_ptr.vmem [resolvable:$true] %s37_s9 }
  0x1d   :  { %p200_p12 = scmp.lt.u32.totalorder %s196_s12, %s326_s2 }
  0x1f   :  { %p202_p13 = pnand %p200_p12, %p197_p11 }
  0x21   :  { %205 = shalt.err (!%p202_p13)
}
  0x22   :  { %s206_s17 = scalar_lea.vmem %s38_s9, 512  ;;  %p211_p1 = scmp.lt.s32.totalorder %s38_s9, %s38_s9 }
  0x23   :  { %p207_p0 = scmp.ne.s32.totalorder %s38_s9, %s206_s17  ;;  %p212_p2 = scmp.lt.s32.totalorder %s206_s17, %s206_s17 }
  0x25   :  { %p213_p3 = por %p212_p2, %p211_p1 }
  0x27   :  { %p214_p4 = pnand %p213_p3, %p207_p0 }
  0x29   :  { %217 = shalt.err (!%p214_p4)
}
  0x2a   :  { %43 = dma.hbm_to_vmem [thread:$0]  %s326_s2, 512, %s38_s9, [#allocation8], %s250_s0, %s250_s0, %s251_s5  }
  0x2b   :  { %240 = dma.done.wait [#allocation5], 16  }
  0x2c   :  { %241 = vsyncadd [#allocation5], 4294967280 }
  0x2d   :  { %242 = dma.done.wait [#allocation3], 512  }
  0x2e   :  { %243 = vsyncadd [#allocation3], 4294966784 }
  0x2f   :  { %244 = dma.done.wait [#allocation8], 512  }
  0x30   :  { %245 = vsyncadd [#allocation8], 4294966784 }
  0x31   :  { %53 = sfence }
  0x32   :  { %s58_s19 = sld [smem:[#allocation2]]  ;;  %v253_v0 = vmov 32.0   ;;  %s155_s20 = sld [smem:[#allocation2 + $0x1]]  ;;  %v254_v1 = vmov 0.0   ;;  %v54_v2 = vld [vmem:[#allocation6] sm:$0xff]  ;;  %v55_v3 = vld [vmem:[#allocation6 + $0x8] sm:$0xff] }
  0x33   :  { %131 = vst [vmem:[#allocation9] sm:$0x1] %v253_v0  ;;  %137 = vst [vmem:[#allocation9 + $0x6] sm:$0x3] %v254_v1  ;;  %v56_v4 = vld [vmem:[#allocation6 + $0x10] sm:$0xff]  ;;  %v57_v5 = vld [vmem:[#allocation6 + $0x18] sm:$0xff] }
  0x34   :  { %v64_v7 = vld [vmem:[#allocation7] sm:$0xff]  ;;  %v65_v8 = vld [vmem:[#allocation7 + $0x8] sm:$0xff]  ;;  %v66_v9 = vld [vmem:[#allocation7 + $0x10] sm:$0xff]  ;;  %s255_s2 = smov [#allocation9]  }
  0x35   :  { %v67_v13 = vld [vmem:[#allocation7 + $0x18] sm:$0xff]  ;;  %s144_s21 = sshll.u32 %s255_s2, 4  ;;  %s145_s21 = int_to_ptr.vmem [resolvable:$true] %s144_s21 }
  0x36   :  { %s218_s22 = scalar_lea.vmem %s145_s21, 128  ;;  %p223_p6 = scmp.lt.s32.totalorder %s145_s21, %s145_s21 }
  0x37   :  { %p219_p5 = scmp.ne.s32.totalorder %s145_s21, %s218_s22  ;;  %p224_p7 = scmp.lt.s32.totalorder %s218_s22, %s218_s22 }
  0x38   :  { %v59_v6 = vstv %s58_s19  ;;  %v69_v15 = vstv %s155_s20 }
  0x39   :  { %v60_v10 = vsub.f32 %v54_v2, %v59_v6  ;;  %v61_v11 = vsub.f32 %v55_v3, %v59_v6  ;;  %v62_v12 = vsub.f32 %v56_v4, %v59_v6  ;;  %v63_v14 = vsub.f32 %v57_v5, %v59_v6  ;;  %p225_p8 = por %p224_p7, %p223_p6 }
  0x3a   :  { %v70_v17 = vsub.f32 %v64_v7, %v69_v15  ;;  %v71_v18 = vsub.f32 %v65_v8, %v69_v15  ;;  %v72_v19 = vsub.f32 %v66_v9, %v69_v15  ;;  %v73_v20 = vsub.f32 %v67_v13, %v69_v15 }
  0x3b   :  { %v74_v16 = vadd.f32 %v61_v11, %v60_v10  ;;  %v92_v21 = vmul.f32 %v60_v10, %v60_v10  ;;  %v93_v22 = vmul.f32 %v61_v11, %v61_v11  ;;  %v94_v23 = vmul.f32 %v62_v12, %v62_v12  ;;  %p226_p9 = pnand %p225_p8, %p219_p5 }
  0x3c   :  { %v83_v25 = vadd.f32 %v71_v18, %v70_v17  ;;  %v105_v26 = vmul.f32 %v70_v17, %v70_v17  ;;  %v95_v27 = vmul.f32 %v63_v14, %v63_v14  ;;  %v106_v29 = vmul.f32 %v71_v18, %v71_v18 }
  0x3d   :  { %v75_v24 = vadd.f32 %v74_v16, %v62_v12  ;;  %v96_v28 = vadd.f32 %v93_v22, %v92_v21  ;;  %v107_v30 = vmul.f32 %v72_v19, %v72_v19  ;;  %v118_v33 = vmul.f32 %v70_v17, %v60_v10 }
  0x3e   :  { %v84_v32 = vadd.f32 %v83_v25, %v72_v19  ;;  %v119_v34 = vmul.f32 %v71_v18, %v61_v11  ;;  %v108_v36 = vmul.f32 %v73_v20, %v73_v20  ;;  %v109_v37 = vadd.f32 %v106_v29, %v105_v26 }
  0x3f   :  { %v76_v31 = vadd.f32 %v75_v24, %v63_v14  ;;  %v97_v35 = vadd.f32 %v96_v28, %v94_v23  ;;  %v120_v38 = vmul.f32 %v72_v19, %v62_v12  ;;  %v121_v41 = vmul.f32 %v73_v20, %v63_v14 }
  0x40   :  { %v85_v40 = vadd.f32 %v84_v32, %v73_v20  ;;  %v122_v42 = vadd.f32 %v119_v34, %v118_v33  ;;  %v110_v44 = vadd.f32 %v109_v37, %v107_v30 }
  0x41   :  { %v77_v39 = vrot.slane %v76_v31, 4  ;;  %v98_v43 = vadd.f32 %v97_v35, %v95_v27 }
  0x42   :  { %v86_v46 = vrot.slane %v85_v40, 4  ;;  %v123_v47 = vadd.f32 %v122_v42, %v120_v38  ;;  %v111_v49 = vadd.f32 %v110_v44, %v108_v36 }
  0x43   :  { %v78_v45 = vadd.f32 %v77_v39, %v76_v31  ;;  %v99_v48 = vrot.slane %v98_v43, 4 }
  0x44   :  { %v87_v51 = vadd.f32 %v86_v46, %v85_v40  ;;  %v124_v52 = vadd.f32 %v123_v47, %v121_v41  ;;  %v112_v54 = vrot.slane %v111_v49, 4 }
  0x45   :  { %v79_v50 = vrot.slane %v78_v45, 2  ;;  %v100_v53 = vadd.f32 %v99_v48, %v98_v43 }
  0x46   :  { %v88_v56 = vrot.slane %v87_v51, 2  ;;  %v125_v57 = vrot.slane %v124_v52, 4  ;;  %v113_v59 = vadd.f32 %v112_v54, %v111_v49 }
  0x47   :  { %v80_v55 = vadd.f32 %v79_v50, %v78_v45  ;;  %v101_v58 = vrot.slane %v100_v53, 2 }
  0x48   :  { %v89_v61 = vadd.f32 %v88_v56, %v87_v51  ;;  %v126_v62 = vadd.f32 %v125_v57, %v124_v52  ;;  %v114_v0 = vrot.slane %v113_v59, 2 }
  0x49   :  { %v81_v60 = vrot.slane %v80_v55, 1  ;;  %v102_v63 = vadd.f32 %v101_v58, %v100_v53 }
  0x4a   :  { %v90_v2 = vrot.slane %v89_v61, 1  ;;  %v127_v3 = vrot.slane %v126_v62, 2  ;;  %v115_v5 = vadd.f32 %v114_v0, %v113_v59 }
  0x4b   :  { %v82_v1 = vadd.f32 %v81_v60, %v80_v55  ;;  %v103_v4 = vrot.slane %v102_v63, 1 }
  0x4c   :  { %v91_v6 = vadd.f32 %v90_v2, %v89_v61  ;;  %v128_v7 = vadd.f32 %v127_v3, %v126_v62  ;;  %v116_v9 = vrot.slane %v115_v5, 1 }
  0x4d   :  { %132 = vst [vmem:[#allocation9 + $0x1] sm:$0x1] %v82_v1  ;;  %v104_v8 = vadd.f32 %v103_v4, %v102_v63 }
  0x4e   :  { %133 = vst [vmem:[#allocation9 + $0x2] sm:$0x1] %v91_v6  ;;  %v129_v10 = vrot.slane %v128_v7, 1  ;;  %v117_v11 = vadd.f32 %v116_v9, %v115_v5 }
  0x4f   :  { %134 = vst [vmem:[#allocation9 + $0x3] sm:$0x1] %v104_v8 }
  0x50   :  { %v130_v12 = vadd.f32 %v129_v10, %v128_v7  ;;  %135 = vst [vmem:[#allocation9 + $0x4] sm:$0x1] %v117_v11 }
  0x52   :  { %136 = vst [vmem:[#allocation9 + $0x5] sm:$0x1] %v130_v12 }
  0x53   :  { %229 = shalt.err (!%p226_p9)
}
  0x54   :  { %s230_s25 = scalar_lea.hbm %s327_s3, 128 }
  0x55   :  { %p231_p10 = scmp.ne.s32.totalorder %s327_s3, %s230_s25  ;;  %p234_p11 = scmp.lt.u32.totalorder %s230_s25, %s327_s3 }
  0x57   :  { %p236_p12 = pnand %p234_p11, %p231_p10 }
  0x59   :  { %239 = shalt.err (!%p236_p12)
}
  0x5a   :  { %147 = dma.vmem_to_hbm [thread:$0]  %s145_s21, 128, %s327_s3, [#allocation4]  }
  0x5b   :  { %246 = dma.done.wait [#allocation4], 128  }
  0x5c   :  { %247 = vsyncadd [#allocation4], 4294967168 }
  0x5d   :  { %151 = vsyncpa [#allocation3], 1 }
  0x5e   :  { %152 = vsyncpa [#allocation8], 1 }
  0x5f   :  { %153 = vsyncpa [#allocation4], 1 }
  0x60   :  { %154 = vsyncpa [#allocation5], 1 }

</bundles_post_ra>
